<compile_context>
chip_gen: v7x
topology: tpu7x:2x2x1
jax: 0.10.0
libtpu: 0.0.40
codegen_flags: <defaults>
</compile_context>

<pallas_src>
import functools
import math

import jax
import jax.numpy as jnp
from jax.experimental import pallas as pl
from jax.experimental.pallas import tpu as pltpu


def _round_up(x: int, m: int) -> int:
    return (x + m - 1) // m * m


def _mlp_fused_kernel(x_ref, wt_ref, b_ref, o_ref, *, n_layers: int):
    # x_ref: [TM, Dpad]; wt_ref: [L, Dpad, Dpad]; b_ref: [L, 1, Dpad]; o_ref: [TM, Dpad]
    h = x_ref[...].astype(jnp.float32)
    for l in range(n_layers):                      # static unroll; L is small & trace-time known
        h = jnp.dot(h, wt_ref[l], preferred_element_type=jnp.float32)
        h = h + b_ref[l]
        if l != n_layers - 1:                      # Tanh after every layer except the last
            h = jnp.tanh(h)
    o_ref[...] = h.astype(o_ref.dtype)


def init_mlp_params(key, layers):
    """PyTorch nn.Linear-style init: uniform(-1/sqrt(fan_in), +1/sqrt(fan_in))."""
    params = []
    for i in range(len(layers) - 1):
        fan_in, fan_out = layers[i], layers[i + 1]
        key, kw, kb = jax.random.split(key, 3)
        bound = 1.0 / math.sqrt(fan_in)
        w = jax.random.uniform(kw, (fan_out, fan_in), jnp.float32, -bound, bound)
        b = jax.random.uniform(kb, (fan_out,), jnp.float32, -bound, bound)
        params.append((w, b))
    return params


def prepare_mlp_params(params, lane=128):
    """One-time prep (outside the hot path): transpose to [Din, Dout], zero-pad every
    feature dim to a common lane-dense Dpad, and stack across layers."""
    n_layers = len(params)
    dims = []
    for w, _ in params:
        dims.extend(w.shape)
    d_pad = _round_up(max(dims), lane)

    wt_stack = jnp.zeros((n_layers, d_pad, d_pad), jnp.float32)
    b_stack = jnp.zeros((n_layers, 1, d_pad), jnp.float32)
    for l, (w, b) in enumerate(params):
        dout, din = w.shape
        wt_stack = wt_stack.at[l, :din, :dout].set(jnp.transpose(w))
        b_stack = b_stack.at[l, 0, :dout].set(b)
    out_dim = params[-1][0].shape[0]
    return wt_stack, b_stack, out_dim


@functools.partial(jax.jit, static_argnames=("out_dim", "block_batch"))
def mlp_forward_fused(wt_stack, b_stack, x, *, out_dim, block_batch=256):
    """Whole-MLP forward in a single Pallas kernel. x: [B, Din] f32 -> [B, Dout] f32."""
    B, din = x.shape
    n_layers, d_pad, _ = wt_stack.shape

    # Batch tile: multiple of 8 sublanes; cap so VMEM stays comfortable on v7x (64 MiB).
    tm = min(block_batch, _round_up(B, 8))
    b_pad = _round_up(B, tm)

    # Zero-pad input rows/cols (padded columns stay exactly zero through every layer,
    # because the padded weight rows/cols are zero and tanh(0) == 0).
    x_pad = jnp.zeros((b_pad, d_pad), jnp.float32).at[:B, :din].set(x)

    kernel = functools.partial(_mlp_fused_kernel, n_layers=n_layers)

    flops = 2 * b_pad * d_pad * d_pad * n_layers
    transcendentals = b_pad * d_pad * (n_layers - 1)
    bytes_accessed = 4 * (x_pad.size + wt_stack.size + b_stack.size + b_pad * d_pad)

    out_pad = pl.pallas_call(
        kernel,
        out_shape=jax.ShapeDtypeStruct((b_pad, d_pad), jnp.float32),
        grid=(b_pad // tm,),
        in_specs=[
            # Activations: tiled over batch, lane-dense feature dim.
            pl.BlockSpec((tm, d_pad), lambda i: (i, 0)),
            # Stacked weights: constant block index -> VMEM-resident across the grid.
            pl.BlockSpec((n_layers, d_pad, d_pad), lambda i: (0, 0, 0)),
            # Stacked biases: constant block index -> VMEM-resident across the grid.
            pl.BlockSpec((n_layers, 1, d_pad), lambda i: (0, 0, 0)),
        ],
        out_specs=pl.BlockSpec((tm, d_pad), lambda i: (i, 0)),
        compiler_params=pltpu.CompilerParams(
            dimension_semantics=("parallel",)),
        cost_estimate=pl.CostEstimate(
            flops=flops,
            transcendentals=transcendentals,
            bytes_accessed=bytes_accessed),
    )(x_pad, wt_stack, b_stack)

    return out_pad[:B, :out_dim]


if __name__ == "__main__":
    key = jax.random.PRNGKey(0)
    # HJB-style MLP: input dim 4, two hidden layers of 32, scalar output.
    layers = [4, 32, 32, 1]
    batch = 8

    key, kx = jax.random.split(key)
    x = jax.random.normal(kx, (batch, layers[0]), jnp.float32)

    params = init_mlp_params(key, layers)
    wt_stack, b_stack, out_dim = prepare_mlp_params(params)   # one-time prep

    out = mlp_forward_fused(wt_stack, b_stack, x, out_dim=out_dim)
    out = jax.block_until_ready(out)

    # Pure-JAX reference (unpadded math, PyTorch layout).
    ref = x
    for i, (w, b) in enumerate(params):
        ref = ref @ w.T + b
        if i != len(params) - 1:
            ref = jnp.tanh(ref)

    assert out.shape == (batch, layers[-1])
    assert jnp.allclose(out, ref, atol=1e-5, rtol=1e-5)

    print("KERNEL_OK")
</pallas_src>

<mosaic_0001>
module attributes {stable_mosaic.version = 11 : i64} {
  func.func @_mlp_fused_kernel(%arg0: i32, %arg1: memref<8x128xf32, #tpu.memory_space<vmem>>, %arg2: memref<3x128x128xf32, #tpu.memory_space<vmem>>, %arg3: memref<3x1x128xf32, #tpu.memory_space<vmem>>, %arg4: memref<8x128xf32, #tpu.memory_space<vmem>>) attributes {dimension_semantics = [#tpu.dimension_semantics<parallel>], iteration_bounds = array<i64: 1>, scalar_prefetch = 0 : i64, scratch_operands = 0 : i64, tpu.core_type = #tpu.core_type<tc>, window_params = [{transform_indices = @transform_0, window_bounds = array<i64: 8, 128>}, {pipeline_mode = #tpu.pipeline_mode<synchronous>, transform_indices = @transform_1, window_bounds = array<i64: 3, 128, 128>}, {pipeline_mode = #tpu.pipeline_mode<synchronous>, transform_indices = @transform_2, window_bounds = array<i64: 3, 1, 128>}, {transform_indices = @transform_3, window_bounds = array<i64: 8, 128>}]} {
    %c0 = arith.constant 0 : index
    %c0_0 = arith.constant 0 : index
    %0 = vector.load %arg1[%c0, %c0_0] : memref<8x128xf32, #tpu.memory_space<vmem>>, vector<8x128xf32>
    %c0_1 = arith.constant 0 : index
    %c0_2 = arith.constant 0 : index
    %c0_3 = arith.constant 0 : index
    %1 = vector.load %arg2[%c0_1, %c0_2, %c0_3] : memref<3x128x128xf32, #tpu.memory_space<vmem>>, vector<1x128x128xf32>
    %2 = vector.shape_cast %1 : vector<1x128x128xf32> to vector<128x128xf32>
    %cst = arith.constant dense<0.000000e+00> : vector<8x128xf32>
    %3 = tpu.matmul %0, %2, %cst {dimension_numbers = #tpu.dot_dimension_numbers<[1], [0], [0], [1], [0, 0, 1, 1], [], []>} : vector<8x128xf32>, vector<128x128xf32>, vector<8x128xf32> -> vector<8x128xf32>
    %c0_4 = arith.constant 0 : index
    %c0_5 = arith.constant 0 : index
    %c0_6 = arith.constant 0 : index
    %4 = vector.load %arg3[%c0_4, %c0_5, %c0_6] : memref<3x1x128xf32, #tpu.memory_space<vmem>>, vector<1x1x128xf32>
    %5 = vector.shape_cast %4 : vector<1x1x128xf32> to vector<1x128xf32>
    %6 = vector.broadcast %5 : vector<1x128xf32> to vector<8x128xf32>
    %7 = arith.addf %3, %6 : vector<8x128xf32>
    %8 = math.tanh %7 : vector<8x128xf32>
    %c1 = arith.constant 1 : index
    %c0_7 = arith.constant 0 : index
    %c0_8 = arith.constant 0 : index
    %9 = vector.load %arg2[%c1, %c0_7, %c0_8] : memref<3x128x128xf32, #tpu.memory_space<vmem>>, vector<1x128x128xf32>
    %10 = vector.shape_cast %9 : vector<1x128x128xf32> to vector<128x128xf32>
    %cst_9 = arith.constant dense<0.000000e+00> : vector<8x128xf32>
    %11 = tpu.matmul %8, %10, %cst_9 {dimension_numbers = #tpu.dot_dimension_numbers<[1], [0], [0], [1], [0, 0, 1, 1], [], []>} : vector<8x128xf32>, vector<128x128xf32>, vector<8x128xf32> -> vector<8x128xf32>
    %c1_10 = arith.constant 1 : index
    %c0_11 = arith.constant 0 : index
    %c0_12 = arith.constant 0 : index
    %12 = vector.load %arg3[%c1_10, %c0_11, %c0_12] : memref<3x1x128xf32, #tpu.memory_space<vmem>>, vector<1x1x128xf32>
    %13 = vector.shape_cast %12 : vector<1x1x128xf32> to vector<1x128xf32>
    %14 = vector.broadcast %13 : vector<1x128xf32> to vector<8x128xf32>
    %15 = arith.addf %11, %14 : vector<8x128xf32>
    %16 = math.tanh %15 : vector<8x128xf32>
    %c2 = arith.constant 2 : index
    %c0_13 = arith.constant 0 : index
    %c0_14 = arith.constant 0 : index
    %17 = vector.load %arg2[%c2, %c0_13, %c0_14] : memref<3x128x128xf32, #tpu.memory_space<vmem>>, vector<1x128x128xf32>
    %18 = vector.shape_cast %17 : vector<1x128x128xf32> to vector<128x128xf32>
    %cst_15 = arith.constant dense<0.000000e+00> : vector<8x128xf32>
    %19 = tpu.matmul %16, %18, %cst_15 {dimension_numbers = #tpu.dot_dimension_numbers<[1], [0], [0], [1], [0, 0, 1, 1], [], []>} : vector<8x128xf32>, vector<128x128xf32>, vector<8x128xf32> -> vector<8x128xf32>
    %c2_16 = arith.constant 2 : index
    %c0_17 = arith.constant 0 : index
    %c0_18 = arith.constant 0 : index
    %20 = vector.load %arg3[%c2_16, %c0_17, %c0_18] : memref<3x1x128xf32, #tpu.memory_space<vmem>>, vector<1x1x128xf32>
    %21 = vector.shape_cast %20 : vector<1x1x128xf32> to vector<1x128xf32>
    %22 = vector.broadcast %21 : vector<1x128xf32> to vector<8x128xf32>
    %23 = arith.addf %19, %22 : vector<8x128xf32>
    %c0_19 = arith.constant 0 : index
    %c0_20 = arith.constant 0 : index
    %24 = vector.load %arg4[%c0_19, %c0_20] : memref<8x128xf32, #tpu.memory_space<vmem>>, vector<8x128xf32>
    tpu.vector_store %arg4[%c0_19, %c0_20], %23 {strides = array<i32>} : memref<8x128xf32, #tpu.memory_space<vmem>>, vector<8x128xf32>,
    return
  }
  func.func @transform_0(%arg0: i32) -> (i32, i32) {
    %c0_i32 = arith.constant 0 : i32
    %c0_i32_0 = arith.constant 0 : i32
    return %arg0, %c0_i32 : i32, i32
  }
  func.func @transform_1(%arg0: i32) -> (i32, i32, i32) {
    %c0_i32 = arith.constant 0 : i32
    %c0_i32_0 = arith.constant 0 : i32
    %c0_i32_1 = arith.constant 0 : i32
    %c0_i32_2 = arith.constant 0 : i32
    return %c0_i32, %c0_i32_0, %c0_i32_1 : i32, i32, i32
  }
  func.func @transform_2(%arg0: i32) -> (i32, i32, i32) {
    %c0_i32 = arith.constant 0 : i32
    %c0_i32_0 = arith.constant 0 : i32
    %c0_i32_1 = arith.constant 0 : i32
    %c0_i32_2 = arith.constant 0 : i32
    return %c0_i32, %c0_i32_0, %c0_i32_1 : i32, i32, i32
  }
  func.func @transform_3(%arg0: i32) -> (i32, i32) {
    %c0_i32 = arith.constant 0 : i32
    %c0_i32_0 = arith.constant 0 : i32
    return %arg0, %c0_i32 : i32, i32
  }
}

</mosaic_0001>

<bundles_post_ra>
// kernel: mlp_forward_fused.1
= control target key start
LH: loop header
LB: loop body
LE: loop exit
PB: predicated region body
PF: predicated region fallthrough
CT: control target
= control target key end

     0   :  { %8 = vsyncpa [#allocation3], 0  ;;  %s587_s12 = smov [#allocation2]   ;;  %s670_s0 = inlined_call_operand.vmem [shape: f32[8,128], index: 0, kind: input, shape index: {}]   ;;  %s671_s1 = inlined_call_operand.hbm [shape: f32[3,128,128], index: 1, kind: input, shape index: {}]   ;;  %s672_s2 = inlined_call_operand.vmem [shape: f32[3,1,128], index: 2, kind: input, shape index: {}]   ;;  %s673_s3 = inlined_call_operand.vmem [shape: f32[8,128], index: 3, kind: output, shape index: {}]  }
   0x1   :  { %s16_s13 = sshll.u32 %s587_s12, 4  ;;  %s563_s16 = scalar_lea.hbm %s671_s1, 6144  ;;  %s17_s13 = int_to_ptr.vmem [resolvable:$true] %s16_s13 }
   0x2   :  { %p564_p0 = scmp.ne.s32.totalorder %s671_s1, %s563_s16  ;;  %p567_p1 = scmp.lt.u32.totalorder %s563_s16, %s671_s1 }
   0x4   :  { %p569_p2 = pnand %p567_p1, %p564_p0 }
   0x6   :  { %572 = shalt.err (!%p569_p2)
}
   0x7   :  { %s573_s21 = scalar_lea.vmem %s17_s13, 6144  ;;  %p578_p4 = scmp.lt.s32.totalorder %s17_s13, %s17_s13 }
   0x8   :  { %p574_p3 = scmp.ne.s32.totalorder %s17_s13, %s573_s21  ;;  %p579_p5 = scmp.lt.s32.totalorder %s573_s21, %s573_s21 }
   0xa   :  { %p580_p6 = por %p579_p5, %p578_p4 }
   0xc   :  { %p581_p7 = pnand %p580_p6, %p574_p3 }
   0xe   :  { %584 = shalt.err (!%p581_p7)
}
   0xf   :  { %s588_s22 = smov 128   ;;  %s589_s23 = smov 8  }
  0x10   :  { %22 = dma.hbm_to_vmem [thread:$0]  %s671_s1, 6144, %s17_s13, [#allocation3], %s588_s22, %s588_s22, %s589_s23  }
  0x11   :  { %585 = dma.done.wait [#allocation3], 6144  }
  0x12   :  { %586 = vsyncadd [#allocation3], 4294961152  ;;  %v590_v0 = vmov 0.0|0.0   ;;  %vm591_vm0 = vmmov 0   ;;  %v592_v1 = vmov 0.0   ;;  %v29_v2 = vld [vmem:[#allocation2] sm:$0xff] }
  0x13   :  { %481 = vmatprep.subr.bf16.mxu0 %v590_v0  ;;  %408 = vmatprep.mubr.msk.f32.mxu0 %vm591_vm0, %v592_v1  ;;  %v30_v3 = vld [vmem:[#allocation2 + $0x8] sm:$0xff]  ;;  %v31_v4 = vld [vmem:[#allocation2 + $0x10] sm:$0xff]  ;;  %v32_v6 = vld [vmem:[#allocation2 + $0x18] sm:$0xff] }
  0x14   :  { %505 = vmatprep.subr.bf16.mxu1 %v590_v0  ;;  %443 = vmatprep.mubr.msk.f32.mxu1 %vm591_vm0, %v592_v1  ;;  %v482_v5 = vpack.c.bf16 %v30_v3, %v29_v2  ;;  %v485_v7 = vpack.c.bf16 %v32_v6, %v31_v4  ;;  %v33_v8 = vld [vmem:[#allocation2 + $0x20] sm:$0xff]  ;;  %v34_v9 = vld [vmem:[#allocation2 + $0x28] sm:$0xff]  ;;  %v126_v12 = vld [vmem:[#allocation2 + $0x90] sm:$0xff] }
  0x15   :  { %v124_v10 = vld [vmem:[#allocation2 + $0x80] sm:$0xff]  ;;  %v125_v11 = vld [vmem:[#allocation2 + $0x88] sm:$0xff]  ;;  %v127_v13 = vld [vmem:[#allocation2 + $0x98] sm:$0xff]  ;;  %v488_v14 = vpack.c.bf16 %v34_v9, %v33_v8 }
  0x16   :  { %483 = vmatpush3.bf16.msra.mxu0 %v482_v5  ;;  %v506_v15 = vpack.c.bf16 %v125_v11, %v124_v10  ;;  %v35_v16 = vld [vmem:[#allocation2 + $0x30] sm:$0xff]  ;;  %v36_v17 = vld [vmem:[#allocation2 + $0x38] sm:$0xff]  ;;  %v509_v18 = vpack.c.bf16 %v127_v13, %v126_v12  ;;  %v128_v19 = vld [vmem:[#allocation2 + $0xa0] sm:$0xff] }
  0x17   :  { %484 = vmatprep.subr.bf16.mxu0 %v590_v0  ;;  %v129_v20 = vld [vmem:[#allocation2 + $0xa8] sm:$0xff]  ;;  %v491_v21 = vpack.c.bf16 %v36_v17, %v35_v16  ;;  %v37_v22 = vld [vmem:[#allocation2 + $0x40] sm:$0xff]  ;;  %v130_v25 = vld [vmem:[#allocation2 + $0xb0] sm:$0xff] }
  0x18   :  { %507 = vmatpush3.bf16.msra.mxu1 %v506_v15  ;;  %v38_v23 = vld [vmem:[#allocation2 + $0x48] sm:$0xff]  ;;  %v512_v24 = vpack.c.bf16 %v129_v20, %v128_v19  ;;  %v131_v26 = vld [vmem:[#allocation2 + $0xb8] sm:$0xff]  ;;  %v39_v28 = vld [vmem:[#allocation2 + $0x50] sm:$0xff] }
  0x19   :  { %508 = vmatprep.subr.bf16.mxu1 %v590_v0  ;;  %v494_v27 = vpack.c.bf16 %v38_v23, %v37_v22  ;;  %v40_v29 = vld [vmem:[#allocation2 + $0x58] sm:$0xff]  ;;  %v515_v30 = vpack.c.bf16 %v131_v26, %v130_v25  ;;  %v132_v31 = vld [vmem:[#allocation2 + $0xc0] sm:$0xff]  ;;  %v133_v32 = vld [vmem:[#allocation2 + $0xc8] sm:$0xff] }
  0x1a   :  { %486 = vmatpush3.bf16.msra.mxu0 %v485_v7  ;;  %v497_v33 = vpack.c.bf16 %v40_v29, %v39_v28  ;;  %v41_v34 = vld [vmem:[#allocation2 + $0x60] sm:$0xff]  ;;  %v42_v35 = vld [vmem:[#allocation2 + $0x68] sm:$0xff]  ;;  %v518_v36 = vpack.c.bf16 %v133_v32, %v132_v31  ;;  %v43_v38 = vld [vmem:[#allocation2 + $0x70] sm:$0xff] }
  0x1b   :  { %487 = vmatprep.subr.bf16.mxu0 %v590_v0  ;;  %v500_v37 = vpack.c.bf16 %v42_v35, %v41_v34  ;;  %v44_v39 = vld [vmem:[#allocation2 + $0x78] sm:$0xff]  ;;  %v28_v41 = vld [vmem:[%s670_s0] sm:$0xff]  ;;  %v134_v42 = vld [vmem:[#allocation2 + $0xd0] sm:$0xff] }
  0x1c   :  { %510 = vmatpush3.bf16.msra.mxu1 %v509_v18  ;;  %v503_v40 = vpack.c.bf16 %v44_v39, %v43_v38  ;;  %v135_v43 = vld [vmem:[#allocation2 + $0xd8] sm:$0xff]  ;;  %v136_v45 = vld [vmem:[#allocation2 + $0xe0] sm:$0xff]  ;;  %v137_v46 = vld [vmem:[#allocation2 + $0xe8] sm:$0xff] }
  0x1d   :  { %511 = vmatprep.subr.bf16.mxu1 %v590_v0  ;;  %v521_v44 = vpack.c.bf16 %v135_v43, %v134_v42  ;;  %v524_v47 = vpack.c.bf16 %v137_v46, %v136_v45  ;;  %v138_v48 = vld [vmem:[#allocation2 + $0xf0] sm:$0xff]  ;;  %v139_v49 = vld [vmem:[#allocation2 + $0xf8] sm:$0xff]  ;;  %v220_v51 = vld [vmem:[#allocation2 + $0x100] sm:$0xff] }
  0x1e   :  { %489 = vmatpush3.bf16.msra.mxu0 %v488_v14  ;;  %v527_v50 = vpack.c.bf16 %v139_v49, %v138_v48  ;;  %v221_v52 = vld [vmem:[#allocation2 + $0x108] sm:$0xff]  ;;  %v222_v53 = vld [vmem:[#allocation2 + $0x110] sm:$0xff]  ;;  %v223_v55 = vld [vmem:[#allocation2 + $0x118] sm:$0xff] }
  0x1f   :  { %490 = vmatprep.subr.bf16.mxu0 %v590_v0  ;;  %v530_v54 = vpack.c.bf16 %v221_v52, %v220_v51  ;;  %v533_v56 = vpack.c.bf16 %v223_v55, %v222_v53  ;;  %v224_v57 = vld [vmem:[#allocation2 + $0x120] sm:$0xff]  ;;  %v225_v58 = vld [vmem:[#allocation2 + $0x128] sm:$0xff]  ;;  %v226_v60 = vld [vmem:[#allocation2 + $0x130] sm:$0xff] }
  0x20   :  { %513 = vmatpush3.bf16.msra.mxu1 %v512_v24  ;;  %v536_v59 = vpack.c.bf16 %v225_v58, %v224_v57  ;;  %v227_v61 = vld [vmem:[#allocation2 + $0x138] sm:$0xff]  ;;  %v228_v63 = vld [vmem:[#allocation2 + $0x140] sm:$0xff]  ;;  %v230_v8 = vld [vmem:[#allocation2 + $0x150] sm:$0xff] }
  0x21   :  { %514 = vmatprep.subr.bf16.mxu1 %v590_v0  ;;  %v539_v62 = vpack.c.bf16 %v227_v61, %v226_v60  ;;  %v320_v3 = vld [vmem:[%s672_s2] ss:$0 sm:$0xff]  ;;  %v231_v9 = vld [vmem:[#allocation2 + $0x158] sm:$0xff]  ;;  %v233_v12 = vld [vmem:[#allocation2 + $0x168] sm:$0xff] }
  0x22   :  { %492 = vmatpush3.bf16.msra.mxu0 %v491_v21  ;;  %v545_v10 = vpack.c.bf16 %v231_v9, %v230_v8  ;;  %v232_v11 = vld [vmem:[#allocation2 + $0x160] sm:$0xff]  ;;  %v234_v14 = vld [vmem:[#allocation2 + $0x170] sm:$0xff]  ;;  %v235_v15 = vld [vmem:[#allocation2 + $0x178] sm:$0xff] }
  0x23   :  { %493 = vmatprep.subr.bf16.mxu0 %v590_v0  ;;  %v548_v13 = vpack.c.bf16 %v233_v12, %v232_v11  ;;  %v551_v16 = vpack.c.bf16 %v235_v15, %v234_v14  ;;  %v322_v17 = vld [vmem:[%s672_s2 + $0x1] ss:$0 sm:$0xff]  ;;  %v324_v22 = vld [vmem:[%s672_s2 + $0x2] ss:$0 sm:$0xff] }
  0x24   :  { %516 = vmatpush3.bf16.msra.mxu1 %v515_v30 }
  0x25   :  { %517 = vmatprep.subr.bf16.mxu1 %v590_v0 }
  0x26   :  { %495 = vmatpush3.bf16.msra.mxu0 %v494_v27 }
  0x27   :  { %496 = vmatprep.subr.bf16.mxu0 %v590_v0 }
  0x28   :  { %519 = vmatpush3.bf16.msra.mxu1 %v518_v36 }
  0x29   :  { %520 = vmatprep.subr.bf16.mxu1 %v590_v0 }
  0x2a   :  { %498 = vmatpush3.bf16.msra.mxu0 %v497_v33 }
  0x2b   :  { %499 = vmatprep.subr.bf16.mxu0 %v590_v0 }
  0x2c   :  { %522 = vmatpush3.bf16.msra.mxu1 %v521_v44 }
  0x2d   :  { %523 = vmatprep.subr.bf16.mxu1 %v590_v0 }
  0x2e   :  { %501 = vmatpush3.bf16.msra.mxu0 %v500_v37 }
  0x2f   :  { %502 = vmatprep.subr.bf16.mxu0 %v590_v0 }
  0x30   :  { %525 = vmatpush3.bf16.msra.mxu1 %v524_v47 }
  0x31   :  { %526 = vmatprep.subr.bf16.mxu1 %v590_v0 }
  0x32   :  { %504 = vmatpush3.bf16.msra.mxu0 %v503_v40 }
  0x33   :  { %529 = vmatprep.subr.bf16.mxu0 %v590_v0 }
  0x34   :  { %528 = vmatpush3.bf16.msra.mxu1 %v527_v50 }
  0x35   :  { %409 = vmatmul.mubr.f32.vlgmr.msra.gmra.mrb[0].mxu0 %v28_v41 }
  0x36   :  { %478 = vmatprep.mubr.msk.f32.mxu0 %vm591_vm0, %v592_v1  ;;  %531 = vmatpush3.bf16.msra.mxu0 %v530_v54  ;;  %v229_v1 = vld [vmem:[#allocation2 + $0x148] sm:$0xff] }
  0x37   :  { %532 = vmatprep.subr.bf16.mxu0 %v590_v0  ;;  %v542_v2 = vpack.c.bf16 %v229_v1, %v228_v63 }
  0x3a   :  { %534 = vmatpush3.bf16.msra.mxu0 %v533_v56 }
  0x3b   :  { %535 = vmatprep.subr.bf16.mxu0 %v590_v0 }
  0x3e   :  { %537 = vmatpush3.bf16.msra.mxu0 %v536_v59 }
  0x3f   :  { %538 = vmatprep.subr.bf16.mxu0 %v590_v0 }
  0x42   :  { %540 = vmatpush3.bf16.msra.mxu0 %v539_v62 }
  0x43   :  { %541 = vmatprep.subr.bf16.mxu0 %v590_v0 }
  0x46   :  { %543 = vmatpush3.bf16.msra.mxu0 %v542_v2 }
  0x47   :  { %544 = vmatprep.subr.bf16.mxu0 %v590_v0 }
  0x4a   :  { %546 = vmatpush3.bf16.msra.mxu0 %v545_v10 }
  0x4b   :  { %547 = vmatprep.subr.bf16.mxu0 %v590_v0 }
  0x4e   :  { %549 = vmatpush3.bf16.msra.mxu0 %v548_v13 }
  0x4f   :  { %550 = vmatprep.subr.bf16.mxu0 %v590_v0 }
  0x52   :  { %552 = vmatpush3.bf16.msra.mxu0 %v551_v16 }
 0x108   :  { %v118_v4 = vpop.f32.mrb[0].mxu0 }
 0x109   :  { %v119_v5 = vadd.f32 %v320_v3, %v118_v4  ;;  %v410_v6 = vpop.f32.mrb[1].mxu0 }
 0x10b   :  { %559 = vtanh.f32 %v119_v5 }
 0x115   :  { %v560_v7 = vpop.eup %559 }
 0x116   :  { %444 = vmatmul.mubr.f32.vlgmr.msra.gmra.mrb[0].mxu1 %v560_v7 }
 0x1e9   :  { %v214_v18 = vpop.f32.mrb[0].mxu1 }
 0x1ea   :  { %v215_v19 = vadd.f32 %v322_v17, %v214_v18  ;;  %v445_v20 = vpop.f32.mrb[1].mxu1 }
 0x1ec   :  { %561 = vtanh.f32 %v215_v19 }
 0x1f6   :  { %v562_v21 = vpop.eup %561 }
 0x1f7   :  { %479 = vmatmul.mubr.f32.vlgmr.msra.gmra.mrb[2].mxu0 %v562_v21 }
 0x2ca   :  { %v310_v23 = vpop.f32.mrb[2].mxu0 }
 0x2cb   :  { %v311_v24 = vadd.f32 %v324_v22, %v310_v23  ;;  %v480_v25 = vpop.f32.mrb[3].mxu0 }
 0x2cd   :  { %314 = vst [vmem:[%s673_s3] sm:$0xff] %v311_v24 }
 0x2ce   :  { %319 = vsyncpa [#allocation3], 1 }

</bundles_post_ra>
